<compile_context>
chip_gen: v7x
topology: tpu7x:2x2x1
jax: 0.10.0
libtpu: 0.0.40
codegen_flags: <defaults>
</compile_context>

<pallas_src>
import jax
import jax.numpy as jnp
from jax import lax
from jax.experimental import pallas as pl
from jax.experimental.pallas import tpu as pltpu

CHUNK = 8  # recurrence unroll chunk (steps per pl.when-gated block)


def usa_v_kernel(maxlen_ref, len_ref, x_ref,
                 wih_ref, whh_ref, bg_ref,
                 wlin_ref, blin_ref,
                 w1_ref, b1_ref, w2_ref, b2_ref, w3_ref, b3_ref,
                 out_ref,
                 xproj_scr, h_scr, c_scr):
    TB = x_ref.shape[0]
    B = len_ref.shape[0]
    T = TB // B
    H4 = whh_ref.shape[1]
    H = H4 // 4

    # Hoisted input projection (+ fused gate bias): one big MXU matmul with bf16
    # operands and f32 accumulation, staged in VMEM scratch.  Off the h-chain.
    xproj_scr[...] = (jnp.dot(x_ref[...], wih_ref[...],
                              preferred_element_type=jnp.float32)
                      + bg_ref[...])                          # (T*B, 4H) f32

    max_len = maxlen_ref[0]                                   # SMEM scalar
    # Hoisted length-mask broadcast (JAX does not CSE broadcast_in_dim; doing
    # this inside the unrolled loop would emit it T times on the critical path).
    len_b = jnp.broadcast_to(len_ref[...], (B, H))            # (B, H) int32
    whh = whh_ref[...]                                        # (H, 4H) bf16, loop-invariant

    h_scr[...] = jnp.zeros_like(h_scr)
    c_scr[...] = jnp.zeros_like(c_scr)

    def step_at(t_base):
        def step(s, carry):
            h, c = carry
            t = t_base + s
            # Sublane-aligned dynamic row load of the staged Xproj chunk.
            row = pl.multiple_of(t * B, 8)
            xrow = xproj_scr[pl.ds(row, B), :]                 # (B, 4H) f32
            # Single fused-gate matmul on the serial chain: bf16 ops, f32 acc.
            gates = xrow + jnp.dot(h.astype(jnp.bfloat16), whh,
                                   preferred_element_type=jnp.float32)
            # Gate column order is (i, f, o, g): one contiguous sigmoid over 3H
            # lanes + one tanh over H lanes (2 EUP pushes/step instead of 4).
            sig = jax.nn.sigmoid(gates[:, :3 * H])
            i_g = sig[:, 0 * H:1 * H]
            f_g = sig[:, 1 * H:2 * H]
            o_g = sig[:, 2 * H:3 * H]
            g_g = jnp.tanh(gates[:, 3 * H:4 * H])

            c_new = f_g * c + i_g * g_g
            h_new = o_g * jnp.tanh(c_new)

            # pack_padded_sequence semantics: state freezes once t >= length.
            valid = t < len_b                                  # (B, H) bool
            return (jnp.where(valid, h_new, h), jnp.where(valid, c_new, c))
        return step

    # Chunked, max_len-bounded recurrence: whole chunks past the longest real
    # sequence are skipped entirely (the masking already makes partial steps
    # inside the final chunk numerical no-ops).
    n_chunks = (T + CHUNK - 1) // CHUNK
    for chunk in range(n_chunks):
        c_start = chunk * CHUNK
        steps_here = min(CHUNK, T - c_start)

        @pl.when(c_start < max_len)
        def _(c_start=c_start, steps_here=steps_here):
            h0 = h_scr[...]
            c0 = c_scr[...]
            h_f, c_f = lax.fori_loop(0, steps_here, step_at(c_start),
                                     (h0, c0), unroll=True)
            h_scr[...] = h_f
            c_scr[...] = c_f

    h_final = h_scr[...]
    # RNNEncoder.linear_1 (dropout identity in eval) -- tiny, done once, f32.
    y1 = jnp.dot(h_final, wlin_ref[...], preferred_element_type=jnp.float32) + blin_ref[...]
    # SubNet: y_2 = tanh(L2(tanh(L1(x)))), preds = L3(y_2)
    z1 = jnp.tanh(jnp.dot(y1, w1_ref[...], preferred_element_type=jnp.float32) + b1_ref[...])
    z2 = jnp.tanh(jnp.dot(z1, w2_ref[...], preferred_element_type=jnp.float32) + b2_ref[...])
    out_ref[...] = jnp.dot(z2, w3_ref[...], preferred_element_type=jnp.float32) + b3_ref[...]


def usa_v_forward(visual, v_len, p):
    """visual: (T, B, D_in) f32, v_len: (B,) int lengths. Returns preds_v (B, n_class)."""
    T, B, D_in = visual.shape
    H = p["whh"].shape[0]
    n_class = p["w3"].shape[1]

    # Pad batch to a multiple of 8 sublanes; padded rows get length 0 so they
    # keep the zero initial state and are sliced off afterwards.
    B_pad = ((B + 7) // 8) * 8
    if B_pad != B:
        visual = jnp.pad(visual, ((0, 0), (0, B_pad - B), (0, 0)))
        v_len = jnp.pad(v_len, (0, B_pad - B))

    x2d = visual.reshape(T * B_pad, D_in).astype(jnp.bfloat16)   # bf16 MXU operand
    lens = v_len.reshape(B_pad, 1).astype(jnp.int32)
    max_len = jnp.max(v_len).astype(jnp.int32).reshape(1)        # SMEM scalar

    smem = pl.BlockSpec(memory_space=pltpu.MemorySpace.SMEM)
    vmem = pl.BlockSpec(memory_space=pltpu.MemorySpace.VMEM)

    # Explicit scoped-VMEM budget: x(bf16) + xproj scratch(f32) + params + headroom.
    vmem_bytes = (x2d.size * 2) + (T * B_pad * 4 * H * 4) + (4 << 20)
    vmem_bytes = min(max(vmem_bytes, 16 << 20), 64 << 20)

    out = pl.pallas_call(
        usa_v_kernel,
        out_shape=jax.ShapeDtypeStruct((B_pad, n_class), jnp.float32),
        in_specs=[smem, vmem] + [vmem] * 12,
        out_specs=vmem,
        scratch_shapes=[
            pltpu.VMEM((T * B_pad, 4 * H), jnp.float32),   # staged Xproj (+bias)
            pltpu.VMEM((B_pad, H), jnp.float32),           # persistent h across chunks
            pltpu.VMEM((B_pad, H), jnp.float32),           # persistent c across chunks
        ],
        compiler_params=pltpu.CompilerParams(vmem_limit_bytes=vmem_bytes),
    )(max_len, lens, x2d,
      p["wih"], p["whh"], p["bg"],
      p["wlin"], p["blin"],
      p["w1"], p["b1"], p["w2"], p["b2"], p["w3"], p["b3"])
    return out[:B]


def _reorder_ifgo_to_ifog(w_4h_first):
    """Permute the 4H axis (first dim) from PyTorch order (i,f,g,o) to (i,f,o,g)."""
    H = w_4h_first.shape[0] // 4
    return jnp.concatenate([w_4h_first[:2 * H],          # i, f
                            w_4h_first[3 * H:4 * H],      # o
                            w_4h_first[2 * H:3 * H]],     # g
                           axis=0)


def make_params(key, d_vin, d_vh, d_vout, d_prjh, n_class):
    """Deterministic synthetic parameters (PyTorch-style uniform init).

    Kernel layout: fused, pre-transposed, gate columns in (i,f,o,g) order,
    LSTM matmul weights in bf16.  Reference layout ('ref_*'): original f32,
    PyTorch (i,f,g,o) gate order.
    """
    ks = jax.random.split(key, 12)
    u = lambda k, shape, fan: jax.random.uniform(
        k, shape, jnp.float32, -1.0 / jnp.sqrt(fan), 1.0 / jnp.sqrt(fan))

    # LSTM (PyTorch layout: W_ih (4H, D_in), W_hh (4H, H), biases (4H,); order i,f,g,o).
    w_ih = u(ks[0], (4 * d_vh, d_vin), d_vh)
    w_hh = u(ks[1], (4 * d_vh, d_vh), d_vh)
    b_ih = u(ks[2], (4 * d_vh,), d_vh)
    b_hh = u(ks[3], (4 * d_vh,), d_vh)

    # Kernel layout: reorder gates to (i,f,o,g), transpose, cast matmul weights to bf16.
    wih = _reorder_ifgo_to_ifog(w_ih).T.astype(jnp.bfloat16)     # (D_in, 4H)
    whh = _reorder_ifgo_to_ifog(w_hh).T.astype(jnp.bfloat16)     # (H, 4H)
    bg = (_reorder_ifgo_to_ifog(b_ih) + _reorder_ifgo_to_ifog(b_hh))[None, :]  # (1, 4H) f32

    # RNNEncoder.linear_1: (d_vout, d_vh) -> transposed, f32 (tiny, one-shot).
    wlin = u(ks[4], (d_vout, d_vh), d_vh).T
    blin = u(ks[5], (1, d_vout), d_vh)
    # SubNet linears
    w1 = u(ks[6], (d_prjh, d_vout), d_vout).T
    b1 = u(ks[7], (1, d_prjh), d_vout)
    w2 = u(ks[8], (d_prjh, d_prjh), d_prjh).T
    b2 = u(ks[9], (1, d_prjh), d_prjh)
    w3 = u(ks[10], (n_class, d_prjh), d_prjh).T
    b3 = u(ks[11], (1, n_class), d_prjh)

    return dict(wih=wih, whh=whh, bg=bg, wlin=wlin, blin=blin,
                w1=w1, b1=b1, w2=w2, b2=b2, w3=w3, b3=b3,
                # f32 PyTorch-order copies for the pure-JAX reference.
                ref_wih=w_ih.T, ref_whh=w_hh.T, ref_bg=(b_ih + b_hh)[None, :])


def reference(visual, v_len, p):
    """Pure-JAX f32 reference of the same forward pass (PyTorch i,f,g,o order)."""
    T, B, _ = visual.shape
    H = p["whh"].shape[0]
    h = jnp.zeros((B, H), jnp.float32)
    c = jnp.zeros((B, H), jnp.float32)
    for t in range(T):
        gates = visual[t] @ p["ref_wih"] + h @ p["ref_whh"] + p["ref_bg"]
        i = jax.nn.sigmoid(gates[:, :H])
        f = jax.nn.sigmoid(gates[:, H:2 * H])
        g = jnp.tanh(gates[:, 2 * H:3 * H])
        o = jax.nn.sigmoid(gates[:, 3 * H:])
        c_new = f * c + i * g
        h_new = o * jnp.tanh(c_new)
        valid = (t < v_len)[:, None]
        h = jnp.where(valid, h_new, h)
        c = jnp.where(valid, c_new, c)
    y1 = h @ p["wlin"] + p["blin"]
    z1 = jnp.tanh(y1 @ p["w1"] + p["b1"])
    z2 = jnp.tanh(z1 @ p["w2"] + p["b2"])
    return z2 @ p["w3"] + p["b3"]


if __name__ == "__main__":
    # Small hp: d_vin=16, d_vh=32, d_vout=32, d_prjh=32, n_class=1,
    # n_layer=1, bidirectional=False, seq=8, batch=4.
    T, B = 8, 4
    D_VIN, D_VH, D_VOUT, D_PRJH, N_CLASS = 16, 32, 32, 32, 1

    key = jax.random.PRNGKey(0)
    k_param, k_vis = jax.random.split(key)
    params = make_params(k_param, D_VIN, D_VH, D_VOUT, D_PRJH, N_CLASS)

    visual = jax.random.normal(k_vis, (T, B, D_VIN), jnp.float32)
    v_len = jnp.array([8, 5, 3, 6], dtype=jnp.int32)
    # (sentences, acoustic, a_len, bert_sent* are unused by USA_V.forward)

    preds_v = usa_v_forward(visual, v_len, params)
    preds_v = jax.block_until_ready(preds_v)

    ref = reference(visual, v_len, params)
    assert preds_v.shape == (B, N_CLASS)
    # bf16 matmul operands (f32 accumulation) vs. f32 reference -> relaxed tolerance.
    assert jnp.allclose(preds_v, ref, atol=5e-2, rtol=5e-2), (preds_v, ref)

    print("KERNEL_OK")
</pallas_src>

<mosaic_0001>
module attributes {stable_mosaic.version = 11 : i64} {
  func.func @usa_v_kernel(%arg0: memref<1xi32, #tpu.memory_space<smem>>, %arg1: memref<8x1xi32, #tpu.memory_space<vmem>>, %arg2: memref<64x16xbf16, #tpu.memory_space<vmem>>, %arg3: memref<16x128xbf16, #tpu.memory_space<vmem>>, %arg4: memref<32x128xbf16, #tpu.memory_space<vmem>>, %arg5: memref<1x128xf32, #tpu.memory_space<vmem>>, %arg6: memref<32x32xf32, #tpu.memory_space<vmem>>, %arg7: memref<1x32xf32, #tpu.memory_space<vmem>>, %arg8: memref<32x32xf32, #tpu.memory_space<vmem>>, %arg9: memref<1x32xf32, #tpu.memory_space<vmem>>, %arg10: memref<32x32xf32, #tpu.memory_space<vmem>>, %arg11: memref<1x32xf32, #tpu.memory_space<vmem>>, %arg12: memref<32x1xf32, #tpu.memory_space<vmem>>, %arg13: memref<1x1xf32, #tpu.memory_space<vmem>>, %arg14: memref<8x1xf32, #tpu.memory_space<vmem>>, %arg15: memref<64x128xf32, #tpu.memory_space<vmem>>, %arg16: memref<8x32xf32, #tpu.memory_space<vmem>>, %arg17: memref<8x32xf32, #tpu.memory_space<vmem>>) attributes {dimension_semantics = [], scalar_prefetch = 0 : i64, scratch_operands = 3 : i64, tpu.core_type = #tpu.core_type<tc>} {
    %c0 = arith.constant 0 : index
    %c0_0 = arith.constant 0 : index
    %0 = vector.load %arg2[%c0, %c0_0] : memref<64x16xbf16, #tpu.memory_space<vmem>>, vector<64x16xbf16>
    %c0_1 = arith.constant 0 : index
    %c0_2 = arith.constant 0 : index
    %1 = vector.load %arg3[%c0_1, %c0_2] : memref<16x128xbf16, #tpu.memory_space<vmem>>, vector<16x128xbf16>
    %cst = arith.constant dense<0.000000e+00> : vector<64x128xf32>
    %2 = tpu.matmul %0, %1, %cst {dimension_numbers = #tpu.dot_dimension_numbers<[1], [0], [0], [1], [0, 0, 1, 1], [], []>} : vector<64x16xbf16>, vector<16x128xbf16>, vector<64x128xf32> -> vector<64x128xf32>
    %c0_3 = arith.constant 0 : index
    %c0_4 = arith.constant 0 : index
    %3 = vector.load %arg5[%c0_3, %c0_4] : memref<1x128xf32, #tpu.memory_space<vmem>>, vector<1x128xf32>
    %4 = vector.broadcast %3 : vector<1x128xf32> to vector<64x128xf32>
    %5 = arith.addf %2, %4 : vector<64x128xf32>
    %c0_5 = arith.constant 0 : index
    %c0_6 = arith.constant 0 : index
    %6 = vector.load %arg15[%c0_5, %c0_6] : memref<64x128xf32, #tpu.memory_space<vmem>>, vector<64x128xf32>
    tpu.vector_store %arg15[%c0_5, %c0_6], %5 {strides = array<i32>} : memref<64x128xf32, #tpu.memory_space<vmem>>, vector<64x128xf32>,
    %c0_7 = arith.constant 0 : index
    %7 = memref.load %arg0[%c0_7] : memref<1xi32, #tpu.memory_space<smem>>
    %c0_8 = arith.constant 0 : index
    %c0_9 = arith.constant 0 : index
    %8 = vector.load %arg1[%c0_8, %c0_9] : memref<8x1xi32, #tpu.memory_space<vmem>>, vector<8x1xi32>
    %9 = vector.shape_cast %8 : vector<8x1xi32> to vector<8x1xi32>
    %10 = vector.broadcast %9 : vector<8x1xi32> to vector<8x32xi32>
    %c0_10 = arith.constant 0 : index
    %c0_11 = arith.constant 0 : index
    %11 = vector.load %arg4[%c0_10, %c0_11] : memref<32x128xbf16, #tpu.memory_space<vmem>>, vector<32x128xbf16>
    %cst_12 = arith.constant 0.000000e+00 : f32
    %12 = vector.broadcast %cst_12 : f32 to vector<8x32xf32>
    %c0_13 = arith.constant 0 : index
    %c0_14 = arith.constant 0 : index
    %13 = vector.load %arg16[%c0_13, %c0_14] : memref<8x32xf32, #tpu.memory_space<vmem>>, vector<8x32xf32>
    tpu.vector_store %arg16[%c0_13, %c0_14], %12 {strides = array<i32>} : memref<8x32xf32, #tpu.memory_space<vmem>>, vector<8x32xf32>,
    %cst_15 = arith.constant 0.000000e+00 : f32
    %14 = vector.broadcast %cst_15 : f32 to vector<8x32xf32>
    %c0_16 = arith.constant 0 : index
    %c0_17 = arith.constant 0 : index
    %15 = vector.load %arg17[%c0_16, %c0_17] : memref<8x32xf32, #tpu.memory_space<vmem>>, vector<8x32xf32>
    tpu.vector_store %arg17[%c0_16, %c0_17], %14 {strides = array<i32>} : memref<8x32xf32, #tpu.memory_space<vmem>>, vector<8x32xf32>,
    %c0_i32 = arith.constant 0 : i32
    %16 = arith.cmpi sgt, %7, %c0_i32 : i32
    %17 = arith.extui %16 : i1 to i32
    %c0_i32_18 = arith.constant 0 : i32
    %18 = arith.cmpi ne, %17, %c0_i32_18 : i32
    scf.if %18 {
      %c0_43 = arith.constant 0 : index
      %c0_44 = arith.constant 0 : index
      %43 = vector.load %arg16[%c0_43, %c0_44] : memref<8x32xf32, #tpu.memory_space<vmem>>, vector<8x32xf32>
      %c0_45 = arith.constant 0 : index
      %c0_46 = arith.constant 0 : index
      %44 = vector.load %arg17[%c0_45, %c0_46] : memref<8x32xf32, #tpu.memory_space<vmem>>, vector<8x32xf32>
      %c0_i32_47 = arith.constant 0 : i32
      %c0_i32_48 = arith.constant 0 : i32
      %45 = arith.addi %c0_i32_48, %c0_i32_47 : i32
      %c8_i32 = arith.constant 8 : i32
      %46 = arith.muli %45, %c8_i32 : i32
      %47 = tpu.assume_multiple %46, 8 : i32
      %48 = arith.index_cast %47 : i32 to index
      %c0_49 = arith.constant 0 : index
      %49 = vector.load %arg15[%48, %c0_49] : memref<64x128xf32, #tpu.memory_space<vmem>>, vector<8x128xf32>
      %50 = arith.truncf %43 : vector<8x32xf32> to vector<8x32xbf16>
      %cst_50 = arith.constant dense<0.000000e+00> : vector<8x128xf32>
      %51 = tpu.matmul %50, %11, %cst_50 {dimension_numbers = #tpu.dot_dimension_numbers<[1], [0], [0], [1], [0, 0, 1, 1], [], []>} : vector<8x32xbf16>, vector<32x128xbf16>, vector<8x128xf32> -> vector<8x128xf32>
      %52 = arith.addf %49, %51 : vector<8x128xf32>
      %53 = vector.extract_strided_slice %52 {offsets = [0, 0], sizes = [8, 96], strides = [1, 1]} : vector<8x128xf32> to vector<8x96xf32>
      %54 = arith.negf %53 : vector<8x96xf32>
      %55 = math.exp %54 : vector<8x96xf32>
      %cst_51 = arith.constant 1.000000e+00 : f32
      %56 = vector.broadcast %cst_51 : f32 to vector<8x96xf32>
      %57 = arith.addf %56, %55 : vector<8x96xf32>
      %58 = arith.divf %56, %57 : vector<8x96xf32>
      %59 = vector.extract_strided_slice %58 {offsets = [0, 0], sizes = [8, 32], strides = [1, 1]} : vector<8x96xf32> to vector<8x32xf32>
      %60 = vector.extract_strided_slice %58 {offsets = [0, 32], sizes = [8, 32], strides = [1, 1]} : vector<8x96xf32> to vector<8x32xf32>
      %61 = vector.extract_strided_slice %58 {offsets = [0, 64], sizes = [8, 32], strides = [1, 1]} : vector<8x96xf32> to vector<8x32xf32>
      %62 = vector.extract_strided_slice %52 {offsets = [0, 96], sizes = [8, 32], strides = [1, 1]} : vector<8x128xf32> to vector<8x32xf32>
      %63 = math.tanh %62 : vector<8x32xf32>
      %64 = arith.mulf %60, %44 : vector<8x32xf32>
      %65 = arith.mulf %59, %63 : vector<8x32xf32>
      %66 = arith.addf %64, %65 : vector<8x32xf32>
      %67 = math.tanh %66 : vector<8x32xf32>
      %68 = arith.mulf %61, %67 : vector<8x32xf32>
      %69 = vector.broadcast %45 : i32 to vector<8x32xi32>
      %70 = arith.cmpi slt, %69, %10 : vector<8x32xi32>
      %71 = arith.select %70, %68, %43 : vector<8x32xi1>, vector<8x32xf32>
      %72 = arith.select %70, %66, %44 : vector<8x32xi1>, vector<8x32xf32>
      %c1_i32 = arith.constant 1 : i32
      %c0_i32_52 = arith.constant 0 : i32
      %73 = arith.addi %c0_i32_52, %c1_i32 : i32
      %c8_i32_53 = arith.constant 8 : i32
      %74 = arith.muli %73, %c8_i32_53 : i32
      %75 = tpu.assume_multiple %74, 8 : i32
      %76 = arith.index_cast %75 : i32 to index
      %c0_54 = arith.constant 0 : index
      %77 = vector.load %arg15[%76, %c0_54] : memref<64x128xf32, #tpu.memory_space<vmem>>, vector<8x128xf32>
      %78 = arith.truncf %71 : vector<8x32xf32> to vector<8x32xbf16>
      %cst_55 = arith.constant dense<0.000000e+00> : vector<8x128xf32>
      %79 = tpu.matmul %78, %11, %cst_55 {dimension_numbers = #tpu.dot_dimension_numbers<[1], [0], [0], [1], [0, 0, 1, 1], [], []>} : vector<8x32xbf16>, vector<32x128xbf16>, vector<8x128xf32> -> vector<8x128xf32>
      %80 = arith.addf %77, %79 : vector<8x128xf32>
      %81 = vector.extract_strided_slice %80 {offsets = [0, 0], sizes = [8, 96], strides = [1, 1]} : vector<8x128xf32> to vector<8x96xf32>
      %82 = arith.negf %81 : vector<8x96xf32>
      %83 = math.exp %82 : vector<8x96xf32>
      %cst_56 = arith.constant 1.000000e+00 : f32
      %84 = vector.broadcast %cst_56 : f32 to vector<8x96xf32>
      %85 = arith.addf %84, %83 : vector<8x96xf32>
      %86 = arith.divf %84, %85 : vector<8x96xf32>
      %87 = vector.extract_strided_slice %86 {offsets = [0, 0], sizes = [8, 32], strides = [1, 1]} : vector<8x96xf32> to vector<8x32xf32>
      %88 = vector.extract_strided_slice %86 {offsets = [0, 32], sizes = [8, 32], strides = [1, 1]} : vector<8x96xf32> to vector<8x32xf32>
      %89 = vector.extract_strided_slice %86 {offsets = [0, 64], sizes = [8, 32], strides = [1, 1]} : vector<8x96xf32> to vector<8x32xf32>
      %90 = vector.extract_strided_slice %80 {offsets = [0, 96], sizes = [8, 32], strides = [1, 1]} : vector<8x128xf32> to vector<8x32xf32>
      %91 = math.tanh %90 : vector<8x32xf32>
      %92 = arith.mulf %88, %72 : vector<8x32xf32>
      %93 = arith.mulf %87, %91 : vector<8x32xf32>
      %94 = arith.addf %92, %93 : vector<8x32xf32>
      %95 = math.tanh %94 : vector<8x32xf32>
      %96 = arith.mulf %89, %95 : vector<8x32xf32>
      %97 = vector.broadcast %73 : i32 to vector<8x32xi32>
      %98 = arith.cmpi slt, %97, %10 : vector<8x32xi32>
      %99 = arith.select %98, %96, %71 : vector<8x32xi1>, vector<8x32xf32>
      %100 = arith.select %98, %94, %72 : vector<8x32xi1>, vector<8x32xf32>
      %c2_i32 = arith.constant 2 : i32
      %c0_i32_57 = arith.constant 0 : i32
      %101 = arith.addi %c0_i32_57, %c2_i32 : i32
      %c8_i32_58 = arith.constant 8 : i32
      %102 = arith.muli %101, %c8_i32_58 : i32
      %103 = tpu.assume_multiple %102, 8 : i32
      %104 = arith.index_cast %103 : i32 to index
      %c0_59 = arith.constant 0 : index
      %105 = vector.load %arg15[%104, %c0_59] : memref<64x128xf32, #tpu.memory_space<vmem>>, vector<8x128xf32>
      %106 = arith.truncf %99 : vector<8x32xf32> to vector<8x32xbf16>
      %cst_60 = arith.constant dense<0.000000e+00> : vector<8x128xf32>
      %107 = tpu.matmul %106, %11, %cst_60 {dimension_numbers = #tpu.dot_dimension_numbers<[1], [0], [0], [1], [0, 0, 1, 1], [], []>} : vector<8x32xbf16>, vector<32x128xbf16>, vector<8x128xf32> -> vector<8x128xf32>
      %108 = arith.addf %105, %107 : vector<8x128xf32>
      %109 = vector.extract_strided_slice %108 {offsets = [0, 0], sizes = [8, 96], strides = [1, 1]} : vector<8x128xf32> to vector<8x96xf32>
      %110 = arith.negf %109 : vector<8x96xf32>
      %111 = math.exp %110 : vector<8x96xf32>
      %cst_61 = arith.constant 1.000000e+00 : f32
      %112 = vector.broadcast %cst_61 : f32 to vector<8x96xf32>
      %113 = arith.addf %112, %111 : vector<8x96xf32>
      %114 = arith.divf %112, %113 : vector<8x96xf32>
      %115 = vector.extract_strided_slice %114 {offsets = [0, 0], sizes = [8, 32], strides = [1, 1]} : vector<8x96xf32> to vector<8x32xf32>
      %116 = vector.extract_strided_slice %114 {offsets = [0, 32], sizes = [8, 32], strides = [1, 1]} : vector<8x96xf32> to vector<8x32xf32>
      %117 = vector.extract_strided_slice %114 {offsets = [0, 64], sizes = [8, 32], strides = [1, 1]} : vector<8x96xf32> to vector<8x32xf32>
      %118 = vector.extract_strided_slice %108 {offsets = [0, 96], sizes = [8, 32], strides = [1, 1]} : vector<8x128xf32> to vector<8x32xf32>
      %119 = math.tanh %118 : vector<8x32xf32>
      %120 = arith.mulf %116, %100 : vector<8x32xf32>
      %121 = arith.mulf %115, %119 : vector<8x32xf32>
      %122 = arith.addf %120, %121 : vector<8x32xf32>
      %123 = math.tanh %122 : vector<8x32xf32>
      %124 = arith.mulf %117, %123 : vector<8x32xf32>
      %125 = vector.broadcast %101 : i32 to vector<8x32xi32>
      %126 = arith.cmpi slt, %125, %10 : vector<8x32xi32>
      %127 = arith.select %126, %124, %99 : vector<8x32xi1>, vector<8x32xf32>
      %128 = arith.select %126, %122, %100 : vector<8x32xi1>, vector<8x32xf32>
      %c3_i32 = arith.constant 3 : i32
      %c0_i32_62 = arith.constant 0 : i32
      %129 = arith.addi %c0_i32_62, %c3_i32 : i32
      %c8_i32_63 = arith.constant 8 : i32
      %130 = arith.muli %129, %c8_i32_63 : i32
      %131 = tpu.assume_multiple %130, 8 : i32
      %132 = arith.index_cast %131 : i32 to index
      %c0_64 = arith.constant 0 : index
      %133 = vector.load %arg15[%132, %c0_64] : memref<64x128xf32, #tpu.memory_space<vmem>>, vector<8x128xf32>
      %134 = arith.truncf %127 : vector<8x32xf32> to vector<8x32xbf16>
      %cst_65 = arith.constant dense<0.000000e+00> : vector<8x128xf32>
      %135 = tpu.matmul %134, %11, %cst_65 {dimension_numbers = #tpu.dot_dimension_numbers<[1], [0], [0], [1], [0, 0, 1, 1], [], []>} : vector<8x32xbf16>, vector<32x128xbf16>, vector<8x128xf32> -> vector<8x128xf32>
      %136 = arith.addf %133, %135 : vector<8x128xf32>
      %137 = vector.extract_strided_slice %136 {offsets = [0, 0], sizes = [8, 96], strides = [1, 1]} : vector<8x128xf32> to vector<8x96xf32>
      %138 = arith.negf %137 : vector<8x96xf32>
      %139 = math.exp %138 : vector<8x96xf32>
      %cst_66 = arith.constant 1.000000e+00 : f32
      %140 = vector.broadcast %cst_66 : f32 to vector<8x96xf32>
      %141 = arith.addf %140, %139 : vector<8x96xf32>
      %142 = arith.divf %140, %141 : vector<8x96xf32>
      %143 = vector.extract_strided_slice %142 {offsets = [0, 0], sizes = [8, 32], strides = [1, 1]} : vector<8x96xf32> to vector<8x32xf32>
      %144 = vector.extract_strided_slice %142 {offsets = [0, 32], sizes = [8, 32], strides = [1, 1]} : vector<8x96xf32> to vector<8x32xf32>
      %145 = vector.extract_strided_slice %142 {offsets = [0, 64], sizes = [8, 32], strides = [1, 1]} : vector<8x96xf32> to vector<8x32xf32>
      %146 = vector.extract_strided_slice %136 {offsets = [0, 96], sizes = [8, 32], strides = [1, 1]} : vector<8x128xf32> to vector<8x32xf32>
      %147 = math.tanh %146 : vector<8x32xf32>
      %148 = arith.mulf %144, %128 : vector<8x32xf32>
      %149 = arith.mulf %143, %147 : vector<8x32xf32>
      %150 = arith.addf %148, %149 : vector<8x32xf32>
      %151 = math.tanh %150 : vector<8x32xf32>
      %152 = arith.mulf %145, %151 : vector<8x32xf32>
      %153 = vector.broadcast %129 : i32 to vector<8x32xi32>
      %154 = arith.cmpi slt, %153, %10 : vector<8x32xi32>
      %155 = arith.select %154, %152, %127 : vector<8x32xi1>, vector<8x32xf32>
      %156 = arith.select %154, %150, %128 : vector<8x32xi1>, vector<8x32xf32>
      %c4_i32 = arith.constant 4 : i32
      %c0_i32_67 = arith.constant 0 : i32
      %157 = arith.addi %c0_i32_67, %c4_i32 : i32
      %c8_i32_68 = arith.constant 8 : i32
      %158 = arith.muli %157, %c8_i32_68 : i32
      %159 = tpu.assume_multiple %158, 8 : i32
      %160 = arith.index_cast %159 : i32 to index
      %c0_69 = arith.constant 0 : index
      %161 = vector.load %arg15[%160, %c0_69] : memref<64x128xf32, #tpu.memory_space<vmem>>, vector<8x128xf32>
      %162 = arith.truncf %155 : vector<8x32xf32> to vector<8x32xbf16>
      %cst_70 = arith.constant dense<0.000000e+00> : vector<8x128xf32>
      %163 = tpu.matmul %162, %11, %cst_70 {dimension_numbers = #tpu.dot_dimension_numbers<[1], [0], [0], [1], [0, 0, 1, 1], [], []>} : vector<8x32xbf16>, vector<32x128xbf16>, vector<8x128xf32> -> vector<8x128xf32>
      %164 = arith.addf %161, %163 : vector<8x128xf32>
      %165 = vector.extract_strided_slice %164 {offsets = [0, 0], sizes = [8, 96], strides = [1, 1]} : vector<8x128xf32> to vector<8x96xf32>
      %166 = arith.negf %165 : vector<8x96xf32>
      %167 = math.exp %166 : vector<8x96xf32>
      %cst_71 = arith.constant 1.000000e+00 : f32
      %168 = vector.broadcast %cst_71 : f32 to vector<8x96xf32>
      %169 = arith.addf %168, %167 : vector<8x96xf32>
      %170 = arith.divf %168, %169 : vector<8x96xf32>
      %171 = vector.extract_strided_slice %170 {offsets = [0, 0], sizes = [8, 32], strides = [1, 1]} : vector<8x96xf32> to vector<8x32xf32>
      %172 = vector.extract_strided_slice %170 {offsets = [0, 32], sizes = [8, 32], strides = [1, 1]} : vector<8x96xf32> to vector<8x32xf32>
      %173 = vector.extract_strided_slice %170 {offsets = [0, 64], sizes = [8, 32], strides = [1, 1]} : vector<8x96xf32> to vector<8x32xf32>
      %174 = vector.extract_strided_slice %164 {offsets = [0, 96], sizes = [8, 32], strides = [1, 1]} : vector<8x128xf32> to vector<8x32xf32>
      %175 = math.tanh %174 : vector<8x32xf32>
      %176 = arith.mulf %172, %156 : vector<8x32xf32>
      %177 = arith.mulf %171, %175 : vector<8x32xf32>
      %178 = arith.addf %176, %177 : vector<8x32xf32>
      %179 = math.tanh %178 : vector<8x32xf32>
      %180 = arith.mulf %173, %179 : vector<8x32xf32>
      %181 = vector.broadcast %157 : i32 to vector<8x32xi32>
      %182 = arith.cmpi slt, %181, %10 : vector<8x32xi32>
      %183 = arith.select %182, %180, %155 : vector<8x32xi1>, vector<8x32xf32>
      %184 = arith.select %182, %178, %156 : vector<8x32xi1>, vector<8x32xf32>
      %c5_i32 = arith.constant 5 : i32
      %c0_i32_72 = arith.constant 0 : i32
      %185 = arith.addi %c0_i32_72, %c5_i32 : i32
      %c8_i32_73 = arith.constant 8 : i32
      %186 = arith.muli %185, %c8_i32_73 : i32
      %187 = tpu.assume_multiple %186, 8 : i32
      %188 = arith.index_cast %187 : i32 to index
      %c0_74 = arith.constant 0 : index
      %189 = vector.load %arg15[%188, %c0_74] : memref<64x128xf32, #tpu.memory_space<vmem>>, vector<8x128xf32>
      %190 = arith.truncf %183 : vector<8x32xf32> to vector<8x32xbf16>
      %cst_75 = arith.constant dense<0.000000e+00> : vector<8x128xf32>
      %191 = tpu.matmul %190, %11, %cst_75 {dimension_numbers = #tpu.dot_dimension_numbers<[1], [0], [0], [1], [0, 0, 1, 1], [], []>} : vector<8x32xbf16>, vector<32x128xbf16>, vector<8x128xf32> -> vector<8x128xf32>
      %192 = arith.addf %189, %191 : vector<8x128xf32>
      %193 = vector.extract_strided_slice %192 {offsets = [0, 0], sizes = [8, 96], strides = [1, 1]} : vector<8x128xf32> to vector<8x96xf32>
      %194 = arith.negf %193 : vector<8x96xf32>
      %195 = math.exp %194 : vector<8x96xf32>
      %cst_76 = arith.constant 1.000000e+00 : f32
      %196 = vector.broadcast %cst_76 : f32 to vector<8x96xf32>
      %197 = arith.addf %196, %195 : vector<8x96xf32>
      %198 = arith.divf %196, %197 : vector<8x96xf32>
      %199 = vector.extract_strided_slice %198 {offsets = [0, 0], sizes = [8, 32], strides = [1, 1]} : vector<8x96xf32> to vector<8x32xf32>
      %200 = vector.extract_strided_slice %198 {offsets = [0, 32], sizes = [8, 32], strides = [1, 1]} : vector<8x96xf32> to vector<8x32xf32>
      %201 = vector.extract_strided_slice %198 {offsets = [0, 64], sizes = [8, 32], strides = [1, 1]} : vector<8x96xf32> to vector<8x32xf32>
      %202 = vector.extract_strided_slice %192 {offsets = [0, 96], sizes = [8, 32], strides = [1, 1]} : vector<8x128xf32> to vector<8x32xf32>
      %203 = math.tanh %202 : vector<8x32xf32>
      %204 = arith.mulf %200, %184 : vector<8x32xf32>
      %205 = arith.mulf %199, %203 : vector<8x32xf32>
      %206 = arith.addf %204, %205 : vector<8x32xf32>
      %207 = math.tanh %206 : vector<8x32xf32>
      %208 = arith.mulf %201, %207 : vector<8x32xf32>
      %209 = vector.broadcast %185 : i32 to vector<8x32xi32>
      %210 = arith.cmpi slt, %209, %10 : vector<8x32xi32>
      %211 = arith.select %210, %208, %183 : vector<8x32xi1>, vector<8x32xf32>
      %212 = arith.select %210, %206, %184 : vector<8x32xi1>, vector<8x32xf32>
      %c6_i32 = arith.constant 6 : i32
      %c0_i32_77 = arith.constant 0 : i32
      %213 = arith.addi %c0_i32_77, %c6_i32 : i32
      %c8_i32_78 = arith.constant 8 : i32
      %214 = arith.muli %213, %c8_i32_78 : i32
      %215 = tpu.assume_multiple %214, 8 : i32
      %216 = arith.index_cast %215 : i32 to index
      %c0_79 = arith.constant 0 : index
      %217 = vector.load %arg15[%216, %c0_79] : memref<64x128xf32, #tpu.memory_space<vmem>>, vector<8x128xf32>
      %218 = arith.truncf %211 : vector<8x32xf32> to vector<8x32xbf16>
      %cst_80 = arith.constant dense<0.000000e+00> : vector<8x128xf32>
      %219 = tpu.matmul %218, %11, %cst_80 {dimension_numbers = #tpu.dot_dimension_numbers<[1], [0], [0], [1], [0, 0, 1, 1], [], []>} : vector<8x32xbf16>, vector<32x128xbf16>, vector<8x128xf32> -> vector<8x128xf32>
      %220 = arith.addf %217, %219 : vector<8x128xf32>
      %221 = vector.extract_strided_slice %220 {offsets = [0, 0], sizes = [8, 96], strides = [1, 1]} : vector<8x128xf32> to vector<8x96xf32>
      %222 = arith.negf %221 : vector<8x96xf32>
      %223 = math.exp %222 : vector<8x96xf32>
      %cst_81 = arith.constant 1.000000e+00 : f32
      %224 = vector.broadcast %cst_81 : f32 to vector<8x96xf32>
      %225 = arith.addf %224, %223 : vector<8x96xf32>
      %226 = arith.divf %224, %225 : vector<8x96xf32>
      %227 = vector.extract_strided_slice %226 {offsets = [0, 0], sizes = [8, 32], strides = [1, 1]} : vector<8x96xf32> to vector<8x32xf32>
      %228 = vector.extract_strided_slice %226 {offsets = [0, 32], sizes = [8, 32], strides = [1, 1]} : vector<8x96xf32> to vector<8x32xf32>
      %229 = vector.extract_strided_slice %226 {offsets = [0, 64], sizes = [8, 32], strides = [1, 1]} : vector<8x96xf32> to vector<8x32xf32>
      %230 = vector.extract_strided_slice %220 {offsets = [0, 96], sizes = [8, 32], strides = [1, 1]} : vector<8x128xf32> to vector<8x32xf32>
      %231 = math.tanh %230 : vector<8x32xf32>
      %232 = arith.mulf %228, %212 : vector<8x32xf32>
      %233 = arith.mulf %227, %231 : vector<8x32xf32>
      %234 = arith.addf %232, %233 : vector<8x32xf32>
      %235 = math.tanh %234 : vector<8x32xf32>
      %236 = arith.mulf %229, %235 : vector<8x32xf32>
      %237 = vector.broadcast %213 : i32 to vector<8x32xi32>
      %238 = arith.cmpi slt, %237, %10 : vector<8x32xi32>
      %239 = arith.select %238, %236, %211 : vector<8x32xi1>, vector<8x32xf32>
      %240 = arith.select %238, %234, %212 : vector<8x32xi1>, vector<8x32xf32>
      %c7_i32 = arith.constant 7 : i32
      %c0_i32_82 = arith.constant 0 : i32
      %241 = arith.addi %c0_i32_82, %c7_i32 : i32
      %c8_i32_83 = arith.constant 8 : i32
      %242 = arith.muli %241, %c8_i32_83 : i32
      %243 = tpu.assume_multiple %242, 8 : i32
      %244 = arith.index_cast %243 : i32 to index
      %c0_84 = arith.constant 0 : index
      %245 = vector.load %arg15[%244, %c0_84] : memref<64x128xf32, #tpu.memory_space<vmem>>, vector<8x128xf32>
      %246 = arith.truncf %239 : vector<8x32xf32> to vector<8x32xbf16>
      %cst_85 = arith.constant dense<0.000000e+00> : vector<8x128xf32>
      %247 = tpu.matmul %246, %11, %cst_85 {dimension_numbers = #tpu.dot_dimension_numbers<[1], [0], [0], [1], [0, 0, 1, 1], [], []>} : vector<8x32xbf16>, vector<32x128xbf16>, vector<8x128xf32> -> vector<8x128xf32>
      %248 = arith.addf %245, %247 : vector<8x128xf32>
      %249 = vector.extract_strided_slice %248 {offsets = [0, 0], sizes = [8, 96], strides = [1, 1]} : vector<8x128xf32> to vector<8x96xf32>
      %250 = arith.negf %249 : vector<8x96xf32>
      %251 = math.exp %250 : vector<8x96xf32>
      %cst_86 = arith.constant 1.000000e+00 : f32
      %252 = vector.broadcast %cst_86 : f32 to vector<8x96xf32>
      %253 = arith.addf %252, %251 : vector<8x96xf32>
      %254 = arith.divf %252, %253 : vector<8x96xf32>
      %255 = vector.extract_strided_slice %254 {offsets = [0, 0], sizes = [8, 32], strides = [1, 1]} : vector<8x96xf32> to vector<8x32xf32>
      %256 = vector.extract_strided_slice %254 {offsets = [0, 32], sizes = [8, 32], strides = [1, 1]} : vector<8x96xf32> to vector<8x32xf32>
      %257 = vector.extract_strided_slice %254 {offsets = [0, 64], sizes = [8, 32], strides = [1, 1]} : vector<8x96xf32> to vector<8x32xf32>
      %258 = vector.extract_strided_slice %248 {offsets = [0, 96], sizes = [8, 32], strides = [1, 1]} : vector<8x128xf32> to vector<8x32xf32>
      %259 = math.tanh %258 : vector<8x32xf32>
      %260 = arith.mulf %256, %240 : vector<8x32xf32>
      %261 = arith.mulf %255, %259 : vector<8x32xf32>
      %262 = arith.addf %260, %261 : vector<8x32xf32>
      %263 = math.tanh %262 : vector<8x32xf32>
      %264 = arith.mulf %257, %263 : vector<8x32xf32>
      %265 = vector.broadcast %241 : i32 to vector<8x32xi32>
      %266 = arith.cmpi slt, %265, %10 : vector<8x32xi32>
      %267 = arith.select %266, %264, %239 : vector<8x32xi1>, vector<8x32xf32>
      %268 = arith.select %266, %262, %240 : vector<8x32xi1>, vector<8x32xf32>
      %c8_i32_87 = arith.constant 8 : i32
      %c0_88 = arith.constant 0 : index
      %c0_89 = arith.constant 0 : index
      %269 = vector.load %arg16[%c0_88, %c0_89] : memref<8x32xf32, #tpu.memory_space<vmem>>, vector<8x32xf32>
      tpu.vector_store %arg16[%c0_88, %c0_89], %267 {strides = array<i32>} : memref<8x32xf32, #tpu.memory_space<vmem>>, vector<8x32xf32>,
      %c0_90 = arith.constant 0 : index
      %c0_91 = arith.constant 0 : index
      %270 = vector.load %arg17[%c0_90, %c0_91] : memref<8x32xf32, #tpu.memory_space<vmem>>, vector<8x32xf32>
      tpu.vector_store %arg17[%c0_90, %c0_91], %268 {strides = array<i32>} : memref<8x32xf32, #tpu.memory_space<vmem>>, vector<8x32xf32>,
    } else {
    }
    %c0_19 = arith.constant 0 : index
    %c0_20 = arith.constant 0 : index
    %19 = vector.load %arg16[%c0_19, %c0_20] : memref<8x32xf32, #tpu.memory_space<vmem>>, vector<8x32xf32>
    %c0_21 = arith.constant 0 : index
    %c0_22 = arith.constant 0 : index
    %20 = vector.load %arg6[%c0_21, %c0_22] : memref<32x32xf32, #tpu.memory_space<vmem>>, vector<32x32xf32>
    %cst_23 = arith.constant dense<0.000000e+00> : vector<8x32xf32>
    %21 = tpu.matmul %19, %20, %cst_23 {dimension_numbers = #tpu.dot_dimension_numbers<[1], [0], [0], [1], [0, 0, 1, 1], [], []>} : vector<8x32xf32>, vector<32x32xf32>, vector<8x32xf32> -> vector<8x32xf32>
    %c0_24 = arith.constant 0 : index
    %c0_25 = arith.constant 0 : index
    %22 = vector.load %arg7[%c0_24, %c0_25] : memref<1x32xf32, #tpu.memory_space<vmem>>, vector<1x32xf32>
    %23 = vector.broadcast %22 : vector<1x32xf32> to vector<8x32xf32>
    %24 = arith.addf %21, %23 : vector<8x32xf32>
    %c0_26 = arith.constant 0 : index
    %c0_27 = arith.constant 0 : index
    %25 = vector.load %arg8[%c0_26, %c0_27] : memref<32x32xf32, #tpu.memory_space<vmem>>, vector<32x32xf32>
    %cst_28 = arith.constant dense<0.000000e+00> : vector<8x32xf32>
    %26 = tpu.matmul %24, %25, %cst_28 {dimension_numbers = #tpu.dot_dimension_numbers<[1], [0], [0], [1], [0, 0, 1, 1], [], []>} : vector<8x32xf32>, vector<32x32xf32>, vector<8x32xf32> -> vector<8x32xf32>
    %c0_29 = arith.constant 0 : index
    %c0_30 = arith.constant 0 : index
    %27 = vector.load %arg9[%c0_29, %c0_30] : memref<1x32xf32, #tpu.memory_space<vmem>>, vector<1x32xf32>
    %28 = vector.broadcast %27 : vector<1x32xf32> to vector<8x32xf32>
    %29 = arith.addf %26, %28 : vector<8x32xf32>
    %30 = math.tanh %29 : vector<8x32xf32>
    %c0_31 = arith.constant 0 : index
    %c0_32 = arith.constant 0 : index
    %31 = vector.load %arg10[%c0_31, %c0_32] : memref<32x32xf32, #tpu.memory_space<vmem>>, vector<32x32xf32>
    %cst_33 = arith.constant dense<0.000000e+00> : vector<8x32xf32>
    %32 = tpu.matmul %30, %31, %cst_33 {dimension_numbers = #tpu.dot_dimension_numbers<[1], [0], [0], [1], [0, 0, 1, 1], [], []>} : vector<8x32xf32>, vector<32x32xf32>, vector<8x32xf32> -> vector<8x32xf32>
    %c0_34 = arith.constant 0 : index
    %c0_35 = arith.constant 0 : index
    %33 = vector.load %arg11[%c0_34, %c0_35] : memref<1x32xf32, #tpu.memory_space<vmem>>, vector<1x32xf32>
    %34 = vector.broadcast %33 : vector<1x32xf32> to vector<8x32xf32>
    %35 = arith.addf %32, %34 : vector<8x32xf32>
    %36 = math.tanh %35 : vector<8x32xf32>
    %c0_36 = arith.constant 0 : index
    %c0_37 = arith.constant 0 : index
    %37 = vector.load %arg12[%c0_36, %c0_37] : memref<32x1xf32, #tpu.memory_space<vmem>>, vector<32x1xf32>
    %cst_38 = arith.constant dense<0.000000e+00> : vector<8x1xf32>
    %38 = tpu.matmul %36, %37, %cst_38 {dimension_numbers = #tpu.dot_dimension_numbers<[1], [0], [0], [1], [0, 0, 1, 1], [], []>} : vector<8x32xf32>, vector<32x1xf32>, vector<8x1xf32> -> vector<8x1xf32>
    %c0_39 = arith.constant 0 : index
    %c0_40 = arith.constant 0 : index
    %39 = vector.load %arg13[%c0_39, %c0_40] : memref<1x1xf32, #tpu.memory_space<vmem>>, vector<1x1xf32>
    %40 = vector.broadcast %39 : vector<1x1xf32> to vector<8x1xf32>
    %41 = arith.addf %38, %40 : vector<8x1xf32>
    %c0_41 = arith.constant 0 : index
    %c0_42 = arith.constant 0 : index
    %42 = vector.load %arg14[%c0_41, %c0_42] : memref<8x1xf32, #tpu.memory_space<vmem>>, vector<8x1xf32>
    tpu.vector_store %arg14[%c0_41, %c0_42], %41 {strides = array<i32>} : memref<8x1xf32, #tpu.memory_space<vmem>>, vector<8x1xf32>,
    return
  }
}

</mosaic_0001>

<bundles_post_ra>
// kernel: tpu_custom_call.1
= control target key start
LH: loop header
LB: loop body
LE: loop exit
PB: predicated region body
PF: predicated region fallthrough
CT: control target
= control target key end

     0   :  { %s1926_s0 = inlined_call_operand.<no memory space> [shape: s32[1], index: 0, kind: input, shape index: {}]   ;;  %s1927_s1 = inlined_call_operand.vmem [shape: s32[8,1], index: 1, kind: input, shape index: {}]   ;;  %s1928_s2 = inlined_call_operand.vmem [shape: bf16[64,16], index: 2, kind: input, shape index: {}]   ;;  %s1929_s3 = inlined_call_operand.hbm [shape: bf16[16,128], index: 3, kind: input, shape index: {}]   ;;  %s1930_s4 = inlined_call_operand.hbm [shape: bf16[32,128], index: 4, kind: input, shape index: {}]   ;;  %s1931_s5 = inlined_call_operand.vmem [shape: f32[1,128], index: 5, kind: input, shape index: {}]   ;;  %s1932_s6 = inlined_call_operand.vmem [shape: f32[32,32], index: 6, kind: input, shape index: {}]   ;;  %s1933_s7 = inlined_call_operand.vmem [shape: f32[1,32], index: 7, kind: input, shape index: {}]   ;;  %s1934_s8 = inlined_call_operand.vmem [shape: f32[32,32], index: 8, kind: input, shape index: {}]   ;;  %s1935_s9 = inlined_call_operand.vmem [shape: f32[1,32], index: 9, kind: input, shape index: {}]   ;;  %s1936_s10 = inlined_call_operand.vmem [shape: f32[32,32], index: 10, kind: input, shape index: {}]   ;;  %s1937_s11 = inlined_call_operand.vmem [shape: f32[1,32], index: 11, kind: input, shape index: {}]   ;;  %s1938_s12 = inlined_call_operand.vmem [shape: f32[32,1], index: 12, kind: input, shape index: {}]   ;;  %s1939_s13 = inlined_call_operand.<no memory space> [shape: f32[1,1], index: 13, kind: input, shape index: {}]   ;;  %s1940_s14 = inlined_call_operand.vmem [shape: f32[8,1], index: 14, kind: output, shape index: {}]  }
   0x1   :  { %v20_v0 = vstv %s1939_s13 }
   0x2   :  { %21 = vst [vmem:[#allocation6] sm:$0x1] %v20_v0 }
   0x3   :  { %22 = vsyncpa [#allocation8], 0 }
   0x4   :  { %23 = vsyncpa [#allocation10], 0  ;;  %s1580_s15 = smov [#allocation7]   ;;  %s1532_s19 = scalar_lea.hbm %s1929_s3, 128 }
   0x5   :  { %s35_s16 = sshll.u32 %s1580_s15, 4  ;;  %p1533_p0 = scmp.ne.s32.totalorder %s1929_s3, %s1532_s19  ;;  %s36_s16 = int_to_ptr.vmem [resolvable:$true] %s35_s16 }
   0x6   :  { %p1536_p1 = scmp.lt.u32.totalorder %s1532_s19, %s1929_s3 }
   0x8   :  { %p1538_p2 = pnand %p1536_p1, %p1533_p0 }
   0xa   :  { %1541 = shalt.err (!%p1538_p2)
}
   0xb   :  { %s1542_s13 = scalar_lea.vmem %s36_s16, 128  ;;  %p1547_p4 = scmp.lt.s32.totalorder %s36_s16, %s36_s16 }
   0xc   :  { %p1543_p3 = scmp.ne.s32.totalorder %s36_s16, %s1542_s13  ;;  %p1548_p5 = scmp.lt.s32.totalorder %s1542_s13, %s1542_s13 }
   0xe   :  { %p1549_p6 = por %p1548_p5, %p1547_p4 }
  0x10   :  { %p1550_p7 = pnand %p1549_p6, %p1543_p3 }
  0x12   :  { %1553 = shalt.err (!%p1550_p7)
}
  0x13   :  { %s1581_s24 = smov 64   ;;  %s1582_s25 = smov 4  }
  0x14   :  { %41 = dma.hbm_to_vmem [thread:$0]  %s1929_s3, 128, %s36_s16, [#allocation8], %s1581_s24, %s1581_s24, %s1582_s25  }
  0x15   :  { %s1583_s28 = smov [#allocation9]   ;;  %s1554_s17 = scalar_lea.hbm %s1930_s4, 256 }
  0x16   :  { %s47_s29 = sshll.u32 %s1583_s28, 4  ;;  %p1555_p8 = scmp.ne.s32.totalorder %s1930_s4, %s1554_s17  ;;  %s48_s29 = int_to_ptr.vmem [resolvable:$true] %s47_s29 }
  0x17   :  { %p1558_p9 = scmp.lt.u32.totalorder %s1554_s17, %s1930_s4 }
  0x19   :  { %p1560_p10 = pnand %p1558_p9, %p1555_p8 }
  0x1b   :  { %1563 = shalt.err (!%p1560_p10)
}
  0x1c   :  { %s1564_s22 = scalar_lea.vmem %s48_s29, 256  ;;  %p1569_p12 = scmp.lt.s32.totalorder %s48_s29, %s48_s29 }
  0x1d   :  { %p1565_p11 = scmp.ne.s32.totalorder %s48_s29, %s1564_s22  ;;  %p1570_p13 = scmp.lt.s32.totalorder %s1564_s22, %s1564_s22 }
  0x1f   :  { %p1571_p0 = por %p1570_p13, %p1569_p12 }
  0x21   :  { %p1572_p1 = pnand %p1571_p0, %p1565_p11 }
  0x23   :  { %1575 = shalt.err (!%p1572_p1)
}
  0x24   :  { %53 = dma.hbm_to_vmem [thread:$0]  %s1930_s4, 256, %s48_s29, [#allocation10], %s1581_s24, %s1581_s24, %s1582_s25  }
  0x25   :  { %1576 = dma.done.wait [#allocation8], 128  }
  0x26   :  { %1577 = vsyncadd [#allocation8], 4294967168 }
  0x27   :  { %1578 = dma.done.wait [#allocation10], 256  }
  0x28   :  { %1579 = vsyncadd [#allocation10], 4294967040  ;;  %vm217_vm0 = vcmask 261120   ;;  %v1584_v1 = vmov 0.0   ;;  %v1585_v2 = vmov 0   ;;  %v1459_v7 = vld [vmem:[#allocation7] sm:$0xff]  }
  0x29   :  { %218 = vst.msk [vmem:[#allocation3] sm:$0xff] %vm217_vm0, %v1584_v1  ;;  %219 = vst.msk [vmem:[#allocation4] sm:$0xff] %vm217_vm0, %v1584_v1  ;;  %1458 = vset.pattern.permute.xlu0 %v1585_v2  ;;  %v213_v3 = vld [vmem:[#allocation9] sm:$0xf]  ;;  %v214_v4 = vld [vmem:[#allocation9 + $0x4] sm:$0xf]  ;;  %1301 = vmatprep.subr.bf16.mxu0 %v1459_v7 }
  0x2a   :  { %v215_v5 = vld [vmem:[#allocation9 + $0x8] sm:$0xf]  ;;  %v216_v6 = vld [vmem:[#allocation9 + $0xc] sm:$0xf]  ;;  %vm122_vm1 = vcmask 130048   ;;  %1443 = vmatprep.subr.bf16.mxu1 %v1459_v7  ;;  %v1461_v9 = vld [vmem:[%s1928_s2 + $0x10] sm:$0xff]   ;;  %1302 = vmatpush3.bf16.msra.mxu0 %v1459_v7 }
  0x2b   :  { %v1460_v8 = vld [vmem:[%s1928_s2] sm:$0xff]   ;;  %1444 = vmatpush3.bf16.msra.mxu1 %v1459_v7  ;;  %v1462_v10 = vld [vmem:[%s1928_s2 + $0x8] sm:$0xff]   ;;  %1307 = vmatprep.mubr.msk.bf16.mxu1 %vm122_vm1, %v1461_v9  ;;  %v1463_v11 = vld [vmem:[%s1928_s2 + $0x18] sm:$0xff]   ;;  %p1225_p2 = scmp.le.s32.totalorder %s1926_s0, 0 }
  0x2c   :  { %1303 = vmatprep.mubr.msk.bf16.mxu0 %vm122_vm1, %v1460_v8  ;;  %v209_v12 = vld [vmem:[%s1927_s1] sm:$0xff]  ;;  %v1722_v31 = vcombine.low (!%p1225_p2), %v213_v3, %v214_v4  ;;  %v1586_v32 = vmov (!%p1225_p2), 0.0   ;;  %vm1587_vm2 = vmmov (!%p1225_p2), 0   ;;  %v1728_v33 = vcombine.low (!%p1225_p2), %v215_v5, %v216_v6  ;;  %s1588_s0 = smov (!%p1225_p2), 32   ;;  %s1590_s18 = smov (!%p1225_p2), 96  }
  0x2d   :  { %211 = vperm.xlu0 %1458, %v209_v12   ;;  %1304 = vmatmul.mubr.msk.bf16.vlgmr.msra.gmra.mrb[0].mxu0 %vm122_vm1, %v1462_v10  ;;  %v1215_v14 = vld [vmem:[%s1931_s5] ss:$0 sm:$0xff]  ;;  %s1589_s5 = smov (!%p1225_p2), 64  }
  0x2e   :  { %1308 = vmatmul.mubr.msk.bf16.vlgmr.msra.gmra.mrb[0].mxu1 %vm122_vm1, %v1463_v11  ;;  %1311 = vmatprep.subr.bf16.mxu0 (!%p1225_p2), %v1586_v32 }
  0x2f   :  { %1315 = vmatprep.mubr.msk.bf16.mxu0 (!%p1225_p2), %vm1587_vm2, %v1586_v32  ;;  %1312 = vmatpush3.bf16.msra.mxu0 (!%p1225_p2), %v1722_v31 }
  0x30   :  { %v224_v34 = vld [vmem:[#allocation3] sm:$0xff] (!%p1225_p2)  ;;  %1319 = vmatprep.subr.bf16.mxu1 (!%p1225_p2), %v1586_v32  ;;  %1313 = vmatprep.subr.bf16.mxu0 (!%p1225_p2), %v1586_v32  ;;  %v225_v43 = vld [vmem:[#allocation4] sm:$0xff] (!%p1225_p2) }
  0x31   :  { %1320 = vmatpush3.bf16.msra.mxu1 (!%p1225_p2), %v1722_v31  ;;  %1323 = vmatprep.mubr.msk.bf16.mxu1 (!%p1225_p2), %vm1587_vm2, %v1586_v32  ;;  %v227_v35 = vpack.c.bf16 (!%p1225_p2), %v224_v34, %v224_v34 }
  0x32   :  { %1321 = vmatprep.subr.bf16.mxu1 (!%p1225_p2), %v1586_v32 }
  0x33   :  { %1314 = vmatpush3.bf16.msra.mxu0 (!%p1225_p2), %v1728_v33 }
  0x34   :  { %1327 = vmatprep.subr.bf16.mxu0 (!%p1225_p2), %v1586_v32 }
  0x35   :  { %1322 = vmatpush3.bf16.msra.mxu1 (!%p1225_p2), %v1728_v33 }
  0x36   :  { %1335 = vmatprep.subr.bf16.mxu1 (!%p1225_p2), %v1586_v32 }
  0xac   :  { %v1714_v13 = vpop.permute.xlu0 %211 }
  0xad   :  { %vm312_vm3 = vcmp.gt.s32.totalorder (!%p1225_p2), %v1714_v13, 0  ;;  %vm393_vm4 = vcmp.gt.s32.totalorder (!%p1225_p2), %v1714_v13, 1  ;;  %vm470_vm5 = vcmp.gt.s32.totalorder (!%p1225_p2), %v1714_v13, 2  ;;  %vm547_vm6 = vcmp.gt.s32.totalorder (!%p1225_p2), %v1714_v13, 3 }
  0xae   :  { %vm624_vm7 = vcmp.gt.s32.totalorder (!%p1225_p2), %v1714_v13, 4  ;;  %vm701_vm8 = vcmp.gt.s32.totalorder (!%p1225_p2), %v1714_v13, 5  ;;  %vm778_vm9 = vcmp.gt.s32.totalorder (!%p1225_p2), %v1714_v13, 6  ;;  %vm855_vm10 = vcmp.gt.s32.totalorder (!%p1225_p2), %v1714_v13, 7 }
 0x100   :  { %v1305_v15 = vpop.f32.mrb[0].mxu0 }
 0x101   :  { %v1309_v16 = vpop.f32.mrb[0].mxu1  ;;  %v178_v17 = vadd.f32 %v1305_v15, %v1215_v14  ;;  %v169_v19 = vpop.f32.mrb[1].mxu0  ;;  %223 = sbr.rel (%p1225_p2) target bundleno = 5898 (0x170a), region = 69 }
 0x102   :  { %v194_v18 = vadd.f32 %v1309_v16, %v1215_v14  ;;  %v185_v20 = vpop.f32.mrb[1].mxu1  ;;  %v170_v21 = vadd.f32 %v1215_v14, %v169_v19  ;;  %v1306_v23 = vpop.f32.mrb[2].mxu0 }
 0x103   :  { %v186_v22 = vadd.f32 %v1215_v14, %v185_v20  ;;  %v1310_v24 = vpop.f32.mrb[2].mxu1  ;;  %202 = vst [vmem:[#allocation2 + $0x10] sm:$0xff] %v178_v17  ;;  %v181_v25 = vadd.f32 %v1306_v23, %v1215_v14  ;;  %v172_v27 = vpop.f32.mrb[3].mxu0  ;;  %1316 = vmatmul.mubr.msk.bf16.vlgmr.msra.gmra.mrb[0].mxu0 (!%p1225_p2), %vm217_vm0, %v227_v35 }
 0x104   :  { %206 = vst [vmem:[#allocation2 + $0x30] sm:$0xff] %v194_v18  ;;  %v197_v26 = vadd.f32 %v1310_v24, %v1215_v14  ;;  %v188_v28 = vpop.f32.mrb[3].mxu1  ;;  %200 = vst [vmem:[#allocation2] sm:$0xff] %v170_v21  ;;  %v173_v29 = vadd.f32 %v1215_v14, %v172_v27  ;;  %1328 = vmatpush3.bf16.msra.mxu0 (!%p1225_p2), %v1722_v31  ;;  %1331 = vmatprep.mubr.msk.bf16.mxu0 (!%p1225_p2), %vm1587_vm2, %v1586_v32 }
 0x105   :  { %204 = vst [vmem:[#allocation2 + $0x20] sm:$0xff] %v186_v22  ;;  %v189_v30 = vadd.f32 %v1215_v14, %v188_v28  ;;  %203 = vst [vmem:[#allocation2 + $0x18] sm:$0xff] %v181_v25  ;;  %1329 = vmatprep.subr.bf16.mxu0 (!%p1225_p2), %v1586_v32 }
 0x106   :  { %207 = vst [vmem:[#allocation2 + $0x38] sm:$0xff] %v197_v26  ;;  %201 = vst [vmem:[#allocation2 + $0x8] sm:$0xff] %v173_v29 }
 0x107   :  { %205 = vst [vmem:[#allocation2 + $0x28] sm:$0xff] %v189_v30 }
 0x108   :  { %1330 = vmatpush3.bf16.msra.mxu0 %v1728_v33 }
 0x109   :  { %1343 = vmatprep.subr.bf16.mxu0 %v1586_v32 }
 0x10a   :  { %v397_v22 = vld [vmem:[#allocation2 + $0x10] sm:$0xff] }
 0x10b   :  { %v226_v36 = vld [vmem:[#allocation2] sm:$0xff] }
 0x10d   :  { %v320_v61 = vld [vmem:[#allocation2 + $0x8] sm:$0xff] }
 0x1d6   :  { %v277_v37 = vpop.f32.mrb[0].mxu0 }
 0x1d7   :  { %v283_v38 = vadd.f32 %v277_v37, %v226_v36  ;;  %v1317_v39 = vpop.f32.mrb[1].mxu0 }
 0x1d8   :  { %v280_v40 = vpop.f32.mrb[2].mxu0 }
 0x1d9   :  { %1464 = vtanh.f32 %v283_v38  ;;  %v1318_v41 = vpop.f32.mrb[3].mxu0  ;;  %v1229_v44 = vmul.f32 -1.442695, %v283_v38 }
 0x1db   :  { %1466 = vpow2.f32 %v1229_v44 }
 0x1e3   :  { %v1465_v42 = vpop.eup %1464 }
 0x1e4   :  { %297 = vrot.lane.b32.xlu0 %v1465_v42, %s1588_s0 }
 0x1e5   :  { %v1467_v45 = vpop.eup %1466 }
 0x1e6   :  { %v287_v46 = vadd.f32 1.0, %v1467_v45 }
 0x1e8   :  { %292 = vrot.lane.b32.xlu0 %v225_v43, %s1588_s0  ;;  %1468 = vrcp.f32 %v287_v46 }
 0x1ec   :  { %314 = vrot.lane.b32.xlu0 %v224_v34, %s1589_s5 }
 0x1f2   :  { %v1469_v47 = vpop.eup %1468 }
 0x256   :  { %v298_v48 = vpop.permute.xlu0 %297 }
 0x257   :  { %v300_v49 = vmul.f32 %v1469_v47, %v298_v48  ;;  %v474_v48 = vld [vmem:[#allocation2 + $0x18] sm:$0xff] }
 0x259   :  { %302 = vrot.lane.b32.xlu1 %v300_v49, %s1588_s0 }
 0x25a   :  { %v293_v50 = vpop.permute.xlu0 %292 }
 0x25b   :  { %v295_v51 = vmul.f32 %v1469_v47, %v293_v50 }
 0x25e   :  { %v315_v56 = vpop.permute.xlu0 %314 }
 0x2cb   :  { %v303_v52 = vpop.permute.xlu1 %302 }
 0x2cc   :  { %v305_v53 = vadd.f32 %v303_v52, %v295_v51 }
 0x2ce   :  { %1470 = vtanh.f32 %v305_v53  ;;  %v318_v11 = vsel %vm312_vm3, %v305_v53, %v293_v50 }
 0x2d8   :  { %v1471_v54 = vpop.eup %1470 }
 0x2d9   :  { %308 = vrot.lane.b32.xlu1 %v1471_v54, %s1588_s0 }
 0x34b   :  { %v309_v55 = vpop.permute.xlu1 %308 }
 0x34c   :  { %v311_v57 = vmul.f32 %v1469_v47, %v309_v55 }
 0x34e   :  { %v317_v58 = vsel %vm312_vm3, %v311_v57, %v315_v56 }
 0x34f   :  { %v321_v59 = vpack.c.bf16 %v317_v58, %v317_v58 }
 0x351   :  { %323 = vrot.lane.b32.xlu1 %v321_v59, %s1589_s5 }
 0x3c3   :  { %v324_v60 = vpop.permute.xlu1 %323 }
 0x3c4   :  { %1324 = vmatmul.mubr.msk.bf16.vlgmr.msra.gmra.mrb[0].mxu1 %vm217_vm0, %v324_v60 }
 0x3c5   :  { %1336 = vmatpush3.bf16.msra.mxu1 %v1722_v31  ;;  %1339 = vmatprep.mubr.msk.bf16.mxu1 %vm1587_vm2, %v1586_v32 }
 0x3c6   :  { %1337 = vmatprep.subr.bf16.mxu1 %v1586_v32 }
 0x3c9   :  { %1338 = vmatpush3.bf16.msra.mxu1 %v1728_v33 }
 0x3ca   :  { %1351 = vmatprep.subr.bf16.mxu1 %v1586_v32 }
 0x497   :  { %v362_v62 = vpop.f32.mrb[0].mxu1 }
 0x498   :  { %v368_v63 = vadd.f32 %v362_v62, %v320_v61  ;;  %v1325_v0 = vpop.f32.mrb[1].mxu1 }
 0x499   :  { %v365_v2 = vpop.f32.mrb[2].mxu1 }
 0x49a   :  { %1472 = vtanh.f32 %v368_v63  ;;  %v1326_v3 = vpop.f32.mrb[3].mxu1  ;;  %v1231_v5 = vmul.f32 -1.442695, %v368_v63 }
 0x49c   :  { %1474 = vpow2.f32 %v1231_v5 }
 0x4a4   :  { %v1473_v4 = vpop.eup %1472 }
 0x4a5   :  { %378 = vrot.lane.b32.xlu0 %v1473_v4, %s1588_s0 }
 0x4a6   :  { %v1475_v6 = vpop.eup %1474 }
 0x4a7   :  { %v372_v7 = vadd.f32 1.0, %v1475_v6 }
 0x4a9   :  { %1476 = vrcp.f32 %v372_v7 }
 0x4b3   :  { %v1477_v8 = vpop.eup %1476 }
 0x4b4   :  { %v376_v12 = vmul.f32 %v1477_v8, %v318_v11 }
 0x517   :  { %v379_v9 = vpop.permute.xlu0 %378 }
 0x518   :  { %v381_v10 = vmul.f32 %v1477_v8, %v379_v9 }
 0x51a   :  { %383 = vrot.lane.b32.xlu1 %v381_v10, %s1588_s0 }
 0x58c   :  { %v384_v14 = vpop.permute.xlu1 %383 }
 0x58d   :  { %v386_v15 = vadd.f32 %v384_v14, %v376_v12 }
 0x58f   :  { %1478 = vtanh.f32 %v386_v15  ;;  %v395_v38 = vsel %vm393_vm4, %v386_v15, %v318_v11 }
 0x599   :  { %v1479_v16 = vpop.eup %1478 }
 0x59a   :  { %389 = vrot.lane.b32.xlu0 %v1479_v16, %s1588_s0 }
 0x60c   :  { %v390_v17 = vpop.permute.xlu0 %389 }
 0x60d   :  { %v392_v18 = vmul.f32 %v1477_v8, %v390_v17  ;;  %v551_v8 = vld [vmem:[#allocation2 + $0x20] sm:$0xff] }
 0x60f   :  { %v394_v19 = vsel %vm393_vm4, %v392_v18, %v317_v58 }
 0x610   :  { %v398_v20 = vpack.c.bf16 %v394_v19, %v394_v19 }
 0x612   :  { %400 = vrot.lane.b32.xlu1 %v398_v20, %s1589_s5 }
 0x684   :  { %v401_v21 = vpop.permute.xlu1 %400 }
 0x685   :  { %1332 = vmatmul.mubr.msk.bf16.vlgmr.msra.gmra.mrb[4].mxu0 %vm217_vm0, %v401_v21 }
 0x686   :  { %1344 = vmatpush3.bf16.msra.mxu0 %v1722_v31  ;;  %1347 = vmatprep.mubr.msk.bf16.mxu0 %vm1587_vm2, %v1586_v32 }
 0x687   :  { %1345 = vmatprep.subr.bf16.mxu0 %v1586_v32 }
 0x68a   :  { %1346 = vmatpush3.bf16.msra.mxu0 %v1728_v33 }
 0x68b   :  { %1359 = vmatprep.subr.bf16.mxu0 %v1586_v32 }
 0x758   :  { %v439_v23 = vpop.f32.mrb[4].mxu0 }
 0x759   :  { %v445_v24 = vadd.f32 %v439_v23, %v397_v22  ;;  %v1333_v25 = vpop.f32.mrb[5].mxu0 }
 0x75a   :  { %v442_v26 = vpop.f32.mrb[6].mxu0 }
 0x75b   :  { %1480 = vtanh.f32 %v445_v24  ;;  %v1334_v27 = vpop.f32.mrb[7].mxu0  ;;  %v1233_v29 = vmul.f32 -1.442695, %v445_v24 }
 0x75d   :  { %1482 = vpow2.f32 %v1233_v29 }
 0x765   :  { %v1481_v28 = vpop.eup %1480 }
 0x766   :  { %455 = vrot.lane.b32.xlu0 %v1481_v28, %s1588_s0 }
 0x767   :  { %v1483_v30 = vpop.eup %1482 }
 0x768   :  { %v449_v34 = vadd.f32 1.0, %v1483_v30 }
 0x76a   :  { %1484 = vrcp.f32 %v449_v34 }
 0x774   :  { %v1485_v35 = vpop.eup %1484 }
 0x775   :  { %v453_v39 = vmul.f32 %v1485_v35, %v395_v38 }
 0x7d8   :  { %v456_v36 = vpop.permute.xlu0 %455 }
 0x7d9   :  { %v458_v37 = vmul.f32 %v1485_v35, %v456_v36 }
 0x7db   :  { %460 = vrot.lane.b32.xlu1 %v458_v37, %s1588_s0 }
 0x84d   :  { %v461_v40 = vpop.permute.xlu1 %460 }
 0x84e   :  { %v463_v41 = vadd.f32 %v461_v40, %v453_v39 }
 0x850   :  { %1486 = vtanh.f32 %v463_v41  ;;  %v472_v61 = vsel %vm470_vm5, %v463_v41, %v395_v38 }
 0x85a   :  { %v1487_v42 = vpop.eup %1486 }
 0x85b   :  { %466 = vrot.lane.b32.xlu0 %v1487_v42, %s1588_s0 }
 0x8cd   :  { %v467_v43 = vpop.permute.xlu0 %466 }
 0x8ce   :  { %v469_v44 = vmul.f32 %v1485_v35, %v467_v43  ;;  %v628_v35 = vld [vmem:[#allocation2 + $0x28] sm:$0xff] }
 0x8d0   :  { %v471_v45 = vsel %vm470_vm5, %v469_v44, %v394_v19 }
 0x8d1   :  { %v475_v46 = vpack.c.bf16 %v471_v45, %v471_v45 }
 0x8d3   :  { %477 = vrot.lane.b32.xlu1 %v475_v46, %s1589_s5 }
 0x945   :  { %v478_v47 = vpop.permute.xlu1 %477 }
 0x946   :  { %1340 = vmatmul.mubr.msk.bf16.vlgmr.msra.gmra.mrb[4].mxu1 %vm217_vm0, %v478_v47 }
 0x947   :  { %1352 = vmatpush3.bf16.msra.mxu1 %v1722_v31  ;;  %1355 = vmatprep.mubr.msk.bf16.mxu1 %vm1587_vm2, %v1586_v32 }
 0x948   :  { %1353 = vmatprep.subr.bf16.mxu1 %v1586_v32 }
 0x94b   :  { %1354 = vmatpush3.bf16.msra.mxu1 %v1728_v33 }
 0x94c   :  { %1367 = vmatprep.subr.bf16.mxu1 %v1586_v32 }
 0xa19   :  { %v516_v49 = vpop.f32.mrb[4].mxu1 }
 0xa1a   :  { %v522_v50 = vadd.f32 %v516_v49, %v474_v48  ;;  %v1341_v51 = vpop.f32.mrb[5].mxu1 }
 0xa1b   :  { %v519_v52 = vpop.f32.mrb[6].mxu1 }
 0xa1c   :  { %1488 = vtanh.f32 %v522_v50  ;;  %v1342_v53 = vpop.f32.mrb[7].mxu1  ;;  %v1235_v55 = vmul.f32 -1.442695, %v522_v50 }
 0xa1e   :  { %1490 = vpow2.f32 %v1235_v55  ;;  %v705_v55 = vld [vmem:[#allocation2 + $0x30] sm:$0xff] }
 0xa26   :  { %v1489_v54 = vpop.eup %1488 }
 0xa27   :  { %532 = vrot.lane.b32.xlu0 %v1489_v54, %s1588_s0 }
 0xa28   :  { %v1491_v56 = vpop.eup %1490 }
 0xa29   :  { %v526_v57 = vadd.f32 1.0, %v1491_v56 }
 0xa2b   :  { %1492 = vrcp.f32 %v526_v57 }
 0xa35   :  { %v1493_v58 = vpop.eup %1492 }
 0xa36   :  { %v530_v62 = vmul.f32 %v1493_v58, %v472_v61 }
 0xa99   :  { %v533_v59 = vpop.permute.xlu0 %532 }
 0xa9a   :  { %v535_v60 = vmul.f32 %v1493_v58, %v533_v59 }
 0xa9c   :  { %537 = vrot.lane.b32.xlu1 %v535_v60, %s1588_s0 }
 0xb0e   :  { %v538_v63 = vpop.permute.xlu1 %537 }
 0xb0f   :  { %v540_v0 = vadd.f32 %v538_v63, %v530_v62 }
 0xb11   :  { %1494 = vtanh.f32 %v540_v0  ;;  %v549_v22 = vsel %vm547_vm6, %v540_v0, %v472_v61 }
 0xb1b   :  { %v1495_v2 = vpop.eup %1494 }
 0xb1c   :  { %543 = vrot.lane.b32.xlu0 %v1495_v2, %s1588_s0 }
 0xb8e   :  { %v544_v3 = vpop.permute.xlu0 %543 }
 0xb8f   :  { %v546_v4 = vmul.f32 %v1493_v58, %v544_v3 }
 0xb91   :  { %v548_v5 = vsel %vm547_vm6, %v546_v4, %v471_v45 }
 0xb92   :  { %v552_v6 = vpack.c.bf16 %v548_v5, %v548_v5 }
 0xb94   :  { %554 = vrot.lane.b32.xlu1 %v552_v6, %s1589_s5 }
 0xc06   :  { %v555_v7 = vpop.permute.xlu1 %554 }
 0xc07   :  { %1348 = vmatmul.mubr.msk.bf16.vlgmr.msra.gmra.mrb[8].mxu0 %vm217_vm0, %v555_v7 }
 0xc08   :  { %1360 = vmatpush3.bf16.msra.mxu0 %v1722_v31  ;;  %1363 = vmatprep.mubr.msk.bf16.mxu0 %vm1587_vm2, %v1586_v32 }
 0xc09   :  { %1361 = vmatprep.subr.bf16.mxu0 %v1586_v32 }
 0xc0c   :  { %1362 = vmatpush3.bf16.msra.mxu0 %v1728_v33 }
 0xcda   :  { %v593_v9 = vpop.f32.mrb[8].mxu0 }
 0xcdb   :  { %v599_v10 = vadd.f32 %v593_v9, %v551_v8  ;;  %v1349_v11 = vpop.f32.mrb[9].mxu0 }
 0xcdc   :  { %v596_v12 = vpop.f32.mrb[10].mxu0 }
 0xcdd   :  { %1496 = vtanh.f32 %v599_v10  ;;  %v1350_v14 = vpop.f32.mrb[11].mxu0  ;;  %v1237_v16 = vmul.f32 -1.442695, %v599_v10 }
 0xcdf   :  { %1498 = vpow2.f32 %v1237_v16  ;;  %v782_v16 = vld [vmem:[#allocation2 + $0x38] sm:$0xff] }
 0xce7   :  { %v1497_v15 = vpop.eup %1496 }
 0xce8   :  { %609 = vrot.lane.b32.xlu0 %v1497_v15, %s1588_s0 }
 0xce9   :  { %v1499_v17 = vpop.eup %1498 }
 0xcea   :  { %v603_v18 = vadd.f32 1.0, %v1499_v17 }
 0xcec   :  { %1500 = vrcp.f32 %v603_v18 }
 0xcf6   :  { %v1501_v19 = vpop.eup %1500 }
 0xcf7   :  { %v607_v23 = vmul.f32 %v1501_v19, %v549_v22 }
 0xd5a   :  { %v610_v20 = vpop.permute.xlu0 %609 }
 0xd5b   :  { %v612_v21 = vmul.f32 %v1501_v19, %v610_v20 }
 0xd5d   :  { %614 = vrot.lane.b32.xlu1 %v612_v21, %s1588_s0 }
 0xdcf   :  { %v615_v24 = vpop.permute.xlu1 %614 }
 0xdd0   :  { %v617_v25 = vadd.f32 %v615_v24, %v607_v23 }
 0xdd2   :  { %1502 = vtanh.f32 %v617_v25 }
 0xddc   :  { %v1503_v26 = vpop.eup %1502 }
 0xddd   :  { %620 = vrot.lane.b32.xlu0 %v1503_v26, %s1588_s0 }
 0xe4f   :  { %v621_v27 = vpop.permute.xlu0 %620 }
 0xe50   :  { %v623_v28 = vmul.f32 %v1501_v19, %v621_v27 }
 0xe52   :  { %v625_v29 = vsel %vm624_vm7, %v623_v28, %v548_v5 }
 0xe53   :  { %v629_v30 = vpack.c.bf16 %v625_v29, %v625_v29 }
 0xe55   :  { %631 = vrot.lane.b32.xlu1 %v629_v30, %s1589_s5 }
 0xec7   :  { %v632_v34 = vpop.permute.xlu1 %631 }
 0xec8   :  { %1356 = vmatmul.mubr.msk.bf16.vlgmr.msra.gmra.mrb[8].mxu1 %vm217_vm0, %v632_v34 }
 0xec9   :  { %1368 = vmatpush3.bf16.msra.mxu1 %v1722_v31  ;;  %1371 = vmatprep.mubr.msk.bf16.mxu1 %vm1587_vm2, %v1586_v32 }
 0xeca   :  { %1369 = vmatprep.subr.bf16.mxu1 %v1586_v32 }
 0xecd   :  { %1370 = vmatpush3.bf16.msra.mxu1 %v1728_v33  ;;  %v626_v33 = vsel %vm624_vm7, %v617_v25, %v549_v22 }
 0xf9b   :  { %v670_v36 = vpop.f32.mrb[8].mxu1 }
 0xf9c   :  { %v676_v37 = vadd.f32 %v670_v36, %v628_v35  ;;  %v1357_v38 = vpop.f32.mrb[9].mxu1 }
 0xf9d   :  { %v673_v39 = vpop.f32.mrb[10].mxu1 }
 0xf9e   :  { %1504 = vtanh.f32 %v676_v37  ;;  %v1358_v40 = vpop.f32.mrb[11].mxu1  ;;  %v1239_v42 = vmul.f32 -1.442695, %v676_v37 }
 0xfa0   :  { %1506 = vpow2.f32 %v1239_v42 }
 0xfa8   :  { %v1505_v41 = vpop.eup %1504 }
 0xfa9   :  { %686 = vrot.lane.b32.xlu0 %v1505_v41, %s1588_s0 }
 0xfaa   :  { %v1507_v31 = vpop.eup %1506 }
 0xfab   :  { %v680_v43 = vadd.f32 1.0, %v1507_v31 }
 0xfad   :  { %1508 = vrcp.f32 %v680_v43 }
 0xfb7   :  { %v1509_v44 = vpop.eup %1508 }
 0xfb8   :  { %v684_v46 = vmul.f32 %v1509_v44, %v626_v33 }
0x101b   :  { %v687_v45 = vpop.permute.xlu0 %686 }
0x101c   :  { %v689_v32 = vmul.f32 %v1509_v44, %v687_v45 }
0x101e   :  { %691 = vrot.lane.b32.xlu1 %v689_v32, %s1588_s0 }
0x1090   :  { %v692_v47 = vpop.permute.xlu1 %691 }
0x1091   :  { %v694_v48 = vadd.f32 %v692_v47, %v684_v46 }
0x1093   :  { %1510 = vtanh.f32 %v694_v48  ;;  %v703_v5 = vsel %vm701_vm8, %v694_v48, %v626_v33 }
0x109d   :  { %v1511_v49 = vpop.eup %1510 }
0x109e   :  { %697 = vrot.lane.b32.xlu0 %v1511_v49, %s1588_s0 }
0x1110   :  { %v698_v50 = vpop.permute.xlu0 %697 }
0x1111   :  { %v700_v51 = vmul.f32 %v1509_v44, %v698_v50 }
0x1113   :  { %v702_v52 = vsel %vm701_vm8, %v700_v51, %v625_v29 }
0x1114   :  { %v706_v53 = vpack.c.bf16 %v702_v52, %v702_v52 }
0x1116   :  { %708 = vrot.lane.b32.xlu1 %v706_v53, %s1589_s5 }
0x1188   :  { %v709_v54 = vpop.permute.xlu1 %708 }
0x1189   :  { %1364 = vmatmul.mubr.msk.bf16.vlgmr.msra.gmra.mrb[12].mxu0 %vm217_vm0, %v709_v54 }
0x125c   :  { %v747_v56 = vpop.f32.mrb[12].mxu0 }
0x125d   :  { %v753_v57 = vadd.f32 %v747_v56, %v705_v55  ;;  %v1365_v58 = vpop.f32.mrb[13].mxu0 }
0x125e   :  { %v750_v59 = vpop.f32.mrb[14].mxu0 }
0x125f   :  { %1512 = vtanh.f32 %v753_v57  ;;  %v1366_v60 = vpop.f32.mrb[15].mxu0  ;;  %v1241_v62 = vmul.f32 -1.442695, %v753_v57 }
0x1261   :  { %1514 = vpow2.f32 %v1241_v62 }
0x1269   :  { %v1513_v61 = vpop.eup %1512 }
0x126a   :  { %763 = vrot.lane.b32.xlu0 %v1513_v61, %s1588_s0 }
0x126b   :  { %v1515_v63 = vpop.eup %1514 }
0x126c   :  { %v757_v0 = vadd.f32 1.0, %v1515_v63 }
0x126e   :  { %1516 = vrcp.f32 %v757_v0 }
0x1278   :  { %v1517_v2 = vpop.eup %1516 }
0x1279   :  { %v761_v6 = vmul.f32 %v1517_v2, %v703_v5 }
0x12dc   :  { %v764_v3 = vpop.permute.xlu0 %763 }
0x12dd   :  { %v766_v4 = vmul.f32 %v1517_v2, %v764_v3 }
0x12df   :  { %768 = vrot.lane.b32.xlu1 %v766_v4, %s1588_s0 }
0x1351   :  { %v769_v7 = vpop.permute.xlu1 %768 }
0x1352   :  { %v771_v8 = vadd.f32 %v769_v7, %v761_v6 }
0x1354   :  { %1518 = vtanh.f32 %v771_v8  ;;  %v780_v29 = vsel %vm778_vm9, %v771_v8, %v703_v5 }
0x135e   :  { %v1519_v9 = vpop.eup %1518 }
0x135f   :  { %774 = vrot.lane.b32.xlu0 %v1519_v9, %s1588_s0 }
0x13d1   :  { %v775_v10 = vpop.permute.xlu0 %774 }
0x13d2   :  { %v777_v11 = vmul.f32 %v1517_v2, %v775_v10 }
0x13d4   :  { %v779_v12 = vsel %vm778_vm9, %v777_v11, %v702_v52 }
0x13d5   :  { %v783_v14 = vpack.c.bf16 %v779_v12, %v779_v12 }
0x13d7   :  { %785 = vrot.lane.b32.xlu1 %v783_v14, %s1589_s5 }
0x1449   :  { %v786_v15 = vpop.permute.xlu1 %785 }
0x144a   :  { %1372 = vmatmul.mubr.msk.bf16.vlgmr.msra.gmra.mrb[12].mxu1 %vm217_vm0, %v786_v15 }
0x151d   :  { %v824_v17 = vpop.f32.mrb[12].mxu1 }
0x151e   :  { %v830_v18 = vadd.f32 %v824_v17, %v782_v16  ;;  %v1373_v19 = vpop.f32.mrb[13].mxu1 }
0x151f   :  { %v827_v20 = vpop.f32.mrb[14].mxu1 }
0x1520   :  { %1520 = vtanh.f32 %v830_v18  ;;  %v1374_v21 = vpop.f32.mrb[15].mxu1  ;;  %v1243_v23 = vmul.f32 -1.442695, %v830_v18 }
0x1522   :  { %1522 = vpow2.f32 %v1243_v23 }
0x152a   :  { %v1521_v22 = vpop.eup %1520 }
0x152b   :  { %840 = vrot.lane.b32.xlu0 %v1521_v22, %s1588_s0 }
0x152c   :  { %v1523_v24 = vpop.eup %1522 }
0x152d   :  { %v834_v25 = vadd.f32 1.0, %v1523_v24 }
0x152f   :  { %1524 = vrcp.f32 %v834_v25 }
0x1539   :  { %v1525_v26 = vpop.eup %1524 }
0x153a   :  { %v838_v30 = vmul.f32 %v1525_v26, %v780_v29 }
0x159d   :  { %v841_v27 = vpop.permute.xlu0 %840 }
0x159e   :  { %v843_v28 = vmul.f32 %v1525_v26, %v841_v27 }
0x15a0   :  { %845 = vrot.lane.b32.xlu1 %v843_v28, %s1588_s0 }
0x1612   :  { %v846_v34 = vpop.permute.xlu1 %845 }
0x1613   :  { %v848_v35 = vadd.f32 %v846_v34, %v838_v30 }
0x1615   :  { %1526 = vtanh.f32 %v848_v35  ;;  %v857_v37 = vsel %vm855_vm10, %v848_v35, %v780_v29 }
0x161f   :  { %v1527_v36 = vpop.eup %1526 }
0x1620   :  { %851 = vrot.lane.b32.xlu0 %v1527_v36, %s1588_s0 }
0x1624   :  { %864 = vrot.lane.b32.xlu0 %v857_v37, %s1590_s18 }
0x1692   :  { %v852_v38 = vpop.permute.xlu0 %851 }
0x1693   :  { %v854_v39 = vmul.f32 %v1525_v26, %v852_v38 }
0x1695   :  { %v856_v40 = vsel %vm855_vm10, %v854_v39, %v779_v12 }
0x1696   :  { %859 = vrot.lane.b32.xlu1 %v856_v40, %s1589_s5  ;;  %v865_v41 = vpop.permute.xlu0 %864 }
0x1697   :  { %867 = vst.msk [vmem:[#allocation4] sm:$0xff] %vm217_vm0, %v865_v41 }
0x1708   :  { %v860_v42 = vpop.permute.xlu1 %859 }
0x1709   :  { %862 = vst.msk [vmem:[#allocation3] sm:$0xff] %vm217_vm0, %v860_v42 }
0x170a PF:  { %v869_v31 = vld [vmem:[%s1932_s6] sm:$0xff]  ;;  %v870_v13 = vld [vmem:[%s1932_s6 + $0x8] sm:$0xff]  ;;  %v871_v43 = vld [vmem:[%s1932_s6 + $0x10] sm:$0xff]  ;;  %v1591_v44 = vmov 0.0|0.0   ;;  %vm1592_vm11 = vmmov 0   ;;  %vm1207_vm12 = vcmask 7168  }
0x170b   :  { %1419 = vmatprep.subr.bf16.mxu0 %v1591_v44  ;;  %v1420_v45 = vpack.c.bf16 %v870_v13, %v869_v31  ;;  %v872_v32 = vld [vmem:[%s1932_s6 + $0x18] sm:$0xff]  ;;  %1383 = vmatprep.mubr.msk.f32.mxu0 %vm1592_vm11, %v1584_v1  ;;  %v953_v33 = vld [vmem:[%s1934_s8] sm:$0xff]  ;;  %v954_v46 = vld [vmem:[%s1934_s8 + $0x8] sm:$0xff] }
0x170c   :  { %1425 = vmatprep.subr.bf16.mxu1 %v1591_v44  ;;  %1394 = vmatprep.mubr.msk.f32.mxu1 %vm1592_vm11, %v1584_v1  ;;  %v1423_v47 = vpack.c.bf16 %v872_v32, %v871_v43  ;;  %v1426_v48 = vpack.c.bf16 %v954_v46, %v953_v33  ;;  %v955_v50 = vld [vmem:[%s1934_s8 + $0x10] sm:$0xff]  ;;  %v956_v51 = vld [vmem:[%s1934_s8 + $0x18] sm:$0xff]  ;;  %v1244_v53 = vld [vmem:[%s1933_s7] ss:$0 sm:$0xff] }
0x170d   :  { %1421 = vmatpush3.bf16.msra.mxu0 %v1420_v45  ;;  %v1429_v52 = vpack.c.bf16 %v956_v51, %v955_v50  ;;  %v1038_v57 = vld [vmem:[%s1936_s10] sm:$0xff]  ;;  %v1039_v58 = vld [vmem:[%s1936_s10 + $0x8] sm:$0xff]  ;;  %v1040_v59 = vld [vmem:[%s1936_s10 + $0x10] sm:$0xff] }
0x170e   :  { %1422 = vmatprep.subr.bf16.mxu0 %v1591_v44  ;;  %1427 = vmatpush3.bf16.msra.mxu1 %v1426_v48  ;;  %v1432_v60 = vpack.c.bf16 %v1039_v58, %v1038_v57  ;;  %v1041_v61 = vld [vmem:[%s1936_s10 + $0x18] sm:$0xff]  ;;  %v1123_v4 = vld [vmem:[%s1938_s12] sm:$0xff]  ;;  %v1124_v5 = vld [vmem:[%s1938_s12 + $0x8] sm:$0xff] }
0x170f   :  { %1428 = vmatprep.subr.bf16.mxu1 %v1591_v44  ;;  %v1435_v62 = vpack.c.bf16 %v1041_v61, %v1040_v59  ;;  %v1125_v6 = vld [vmem:[%s1938_s12 + $0x10] sm:$0xff]  ;;  %v1438_v7 = vpack.c.bf16 %v1124_v5, %v1123_v4  ;;  %v1126_v8 = vld [vmem:[%s1938_s12 + $0x18] sm:$0xff]  ;;  %v1248_v10 = vld [vmem:[%s1937_s11] ss:$0 sm:$0xff] }
0x1710   :  { %v868_v49 = vld [vmem:[#allocation3] sm:$0xff]  ;;  %v1441_v9 = vpack.c.bf16 %v1126_v8, %v1125_v6  ;;  %v1250_v16 = vld [vmem:[#allocation6] ss:$0 sm:$0xff] }
0x1711   :  { %1424 = vmatpush3.bf16.msra.mxu0 %v1423_v47 }
0x1712   :  { %1431 = vmatprep.subr.bf16.mxu0 %v1591_v44  ;;  %1430 = vmatpush3.bf16.msra.mxu1 %v1429_v52 }
0x1713   :  { %1437 = vmatprep.subr.bf16.mxu1 %v1591_v44 }
0x1714   :  { %1384 = vmatmul.mubr.msk.f32.vlgmr.msra.gmra.mrb[0].mxu0 %vm217_vm0, %v868_v49 }
0x1715   :  { %1405 = vmatprep.mubr.msk.f32.mxu0 %vm1592_vm11, %v1584_v1  ;;  %1433 = vmatpush3.bf16.msra.mxu0 %v1432_v60 }
0x1716   :  { %1434 = vmatprep.subr.bf16.mxu0 %v1591_v44 }
0x1719   :  { %1436 = vmatpush3.bf16.msra.mxu0 %v1435_v62 }
0x17e7   :  { %v949_v54 = vpop.f32.mrb[0].mxu0 }
0x17e8   :  { %v950_v55 = vadd.f32 %v1244_v53, %v949_v54  ;;  %v1385_v56 = vpop.f32.mrb[1].mxu0 }
0x17ea   :  { %1395 = vmatmul.mubr.msk.f32.vlgmr.msra.gmra.mrb[0].mxu1 %vm217_vm0, %v950_v55 }
0x17eb   :  { %1416 = vmatprep.mubr.msk.f32.mxu1 %vm1592_vm11, %v1584_v1  ;;  %v1246_v1 = vld [vmem:[%s1935_s9] ss:$0 sm:$0xff]  ;;  %1439 = vmatpush3.bf16.msra.mxu1 %v1438_v7 }
0x17ec   :  { %1440 = vmatprep.subr.bf16.mxu1 %v1591_v44 }
0x17ef   :  { %1442 = vmatpush3.bf16.msra.mxu1 %v1441_v9 }
0x18bd   :  { %v1033_v63 = vpop.f32.mrb[0].mxu1 }
0x18be   :  { %v1034_v0 = vadd.f32 %v1246_v1, %v1033_v63  ;;  %v1396_v2 = vpop.f32.mrb[1].mxu1 }
0x18c0   :  { %1528 = vtanh.f32 %v1034_v0 }
0x18ca   :  { %v1529_v3 = vpop.eup %1528 }
0x18cb   :  { %1406 = vmatmul.mubr.msk.f32.vlgmr.msra.gmra.mrb[2].mxu0 %vm217_vm0, %v1529_v3 }
0x199e   :  { %v1118_v11 = vpop.f32.mrb[2].mxu0 }
0x199f   :  { %v1119_v12 = vadd.f32 %v1248_v10, %v1118_v11  ;;  %v1407_v14 = vpop.f32.mrb[3].mxu0 }
0x19a1   :  { %1530 = vtanh.f32 %v1119_v12 }
0x19ab   :  { %v1531_v15 = vpop.eup %1530 }
0x19ac   :  { %1417 = vmatmul.mubr.msk.f32.vlgmr.msra.gmra.mrb[2].mxu1 %vm217_vm0, %v1531_v15 }
0x1a7f   :  { %v1203_v17 = vpop.f32.mrb[2].mxu1 }
0x1a80   :  { %v1204_v18 = vadd.f32 %v1250_v16, %v1203_v17  ;;  %v1418_v19 = vpop.f32.mrb[3].mxu1 }
0x1a82   :  { %1208 = vst.msk [vmem:[%s1940_s14] sm:$0xff] %vm1207_vm12, %v1204_v18 }
0x1a83   :  { %1213 = vsyncpa [#allocation8], 1 }
0x1a84   :  { %1214 = vsyncpa [#allocation10], 1 }

</bundles_post_ra>
